<compile_context>
chip_gen: v7x
topology: tpu7x:2x2x1
jax: 0.10.0
libtpu: 0.0.40
codegen_flags: <defaults>
</compile_context>

<pallas_src>
import jax
import jax.numpy as jnp
from jax.experimental import pallas as pl
from jax.experimental.pallas import tpu as pltpu


def _add_pos_kernel(x_ref, emb_ref, o_ref):
    # Works for both tilings via numpy broadcasting:
    #   path A: x (bB, tT, H) + emb (tT, H)  -> (bB, tT, H)
    #   path B: x (bB, tC)    + emb (1, tC)  -> (bB, tC)
    # Accumulate in f32 (framework type-promotion semantics), cast result.
    x = x_ref[...].astype(jnp.float32)
    e = emb_ref[...].astype(jnp.float32)
    o_ref[...] = (x + e).astype(o_ref.dtype)


def _pick_tile(n, align, cap):
    """Largest multiple of `align` that divides n and is <= cap (or None)."""
    cap = min(n, cap)
    cap -= cap % align
    for t in range(cap, 0, -align):
        if n % t == 0:
            return t
    return None


def _vmem_budget_bytes():
    """Total VMEM we allow the (double-buffered) x/out/emb blocks to use."""
    try:
        kind = jax.devices()[0].device_kind.lower()
    except Exception:
        kind = ""
    if "v5 lite" in kind or "v5e" in kind or "v5litepod" in kind:
        return 12 * 1024 * 1024   # stay safely under v5e's 16 MiB scoped default
    return 24 * 1024 * 1024       # v6e / v7x: 32 MiB scoped default


def positional_embedding_forward(x, embedding, *, min_pallas_bytes=256 * 1024):
    """x: (B, T, H), embedding: (max_len, H). Returns x + embedding[:T]."""
    B, T, H = x.shape
    max_len, He = embedding.shape
    assert He == H, f"hidden-size mismatch: x has {H}, embedding has {He}"
    assert T <= max_len, f"sequence length {T} exceeds positional table {max_len}"

    x_isz = jnp.dtype(x.dtype).itemsize
    e_isz = jnp.dtype(embedding.dtype).itemsize
    budget = _vmem_budget_bytes()

    # --- size gate: tiny shapes are faster as a plain fused XLA add ---------
    if B * T * H * x_isz < min_pallas_bytes:
        ref = (x.astype(jnp.float32)
               + embedding[:T][None, :, :].astype(jnp.float32))
        return ref.astype(x.dtype)

    if H % 128 == 0:
        # ---- path A: last dim H is lane-dense; tile T (and maybe fold B) ----
        # Per T-row bytes, counting double-buffering of x, out and emb tiles:
        #   x: 2*bB*H*x_isz, out: 2*bB*H*x_isz, emb: 2*H*e_isz
        def per_row(bB):
            return H * (4 * bB * x_isz + 2 * e_isz)

        sub_align = max(8, 8 * (4 // max(x_isz, 1)))   # 8 f32, 16 bf16, 32 int8
        row_cap = max(sub_align, budget // per_row(1))
        tT = _pick_tile(T, sub_align, row_cap) or T    # full T always legal
        bB = 1
        if tT == T:
            # Fold batch into the block to avoid many tiny (1, T, H) steps.
            for cand in range(B, 0, -1):
                if B % cand == 0 and tT * per_row(cand) <= budget:
                    bB = cand
                    break
            # Keep >= 2 grid steps when B >= 2 so both v7x TensorCores work.
            if (T // tT) * (B // bB) < 2 and B >= 2:
                for cand in range(B // 2, 0, -1):
                    if B % cand == 0:
                        bB = cand
                        break

        grid = (T // tT, B // bB)                      # batch innermost => emb tile reused
        return pl.pallas_call(
            _add_pos_kernel,
            out_shape=jax.ShapeDtypeStruct((B, T, H), x.dtype),
            grid=grid,
            in_specs=[
                pl.BlockSpec((bB, tT, H), lambda t, b: (b, t, 0)),
                # Full table passed in; grid only touches rows < T.
                pl.BlockSpec((tT, H), lambda t, b: (t, 0)),
            ],
            out_specs=pl.BlockSpec((bB, tT, H), lambda t, b: (b, t, 0)),
            compiler_params=pltpu.CompilerParams(
                dimension_semantics=("parallel", "parallel")),
        )(x, embedding)

    # ---- path B: non-128-multiple H -> flatten each batch row to (C,) -------
    # Fallback path (realistic Connector hidden sizes hit path A).  Batch is
    # tiled in multiples of 8 when possible; for B < 8 the full-B block is
    # sublane-masked, which is acceptable for this rarely-hit fallback.
    C = T * H
    x2 = x.reshape(B, C)
    emb2 = embedding[:T].reshape(1, C)   # slice needed here to flatten (T, H)

    if B >= 8 and B % 8 == 0:
        bB_cap = max(8, budget // (128 * 6 * max(x_isz, e_isz)))
        bB = _pick_tile(B, 8, bB_cap) or B
    else:
        bB = B
    per_col = 4 * bB * x_isz + 2 * e_isz
    col_cap = max(128, budget // per_col)
    tC = (_pick_tile(C, 128, col_cap) if C % 128 == 0 else None) or C

    out2 = pl.pallas_call(
        _add_pos_kernel,
        out_shape=jax.ShapeDtypeStruct((B, C), x.dtype),
        grid=(C // tC, B // bB),
        in_specs=[
            pl.BlockSpec((bB, tC), lambda c, b: (b, c)),
            pl.BlockSpec((1, tC), lambda c, b: (0, c)),   # independent of b
        ],
        out_specs=pl.BlockSpec((bB, tC), lambda c, b: (b, c)),
        compiler_params=pltpu.CompilerParams(
            dimension_semantics=("parallel", "parallel")),
    )(x2, emb2)
    return out2.reshape(B, T, H)


def sinusoidal_table(max_len, hidden_size, dtype=jnp.float32):
    """Same construction as the PyTorch SinusoidalPositionalEmbedding buffer."""
    position = jnp.arange(max_len, dtype=jnp.float32)[:, None]
    div_term = jnp.exp(jnp.arange(0, hidden_size, 2, dtype=jnp.float32)
                       * (-jnp.log(10000.0) / hidden_size))
    emb = jnp.zeros((max_len, hidden_size), jnp.float32)
    emb = emb.at[:, 0::2].set(jnp.sin(position * div_term))
    emb = emb.at[:, 1::2].set(jnp.cos(position * div_term))
    return emb.astype(dtype)


if __name__ == "__main__":
    key = jax.random.PRNGKey(0)
    k1, k2 = jax.random.split(key)

    def ref_add(x, emb):
        T = x.shape[1]
        return (x.astype(jnp.float32)
                + emb[:T][None, :, :].astype(jnp.float32)).astype(x.dtype)

    # Case 1: small, non-128-multiple hidden size (flattened path B).
    B, T, H, MAX_LEN = 2, 8, 32, 16
    x = jax.random.normal(k1, (B, T, H), dtype=jnp.float32)
    emb = sinusoidal_table(MAX_LEN, H)
    out = jax.block_until_ready(
        positional_embedding_forward(x, emb, min_pallas_bytes=0))
    assert out.shape == (B, T, H)
    assert jnp.allclose(out, ref_add(x, emb), atol=1e-6), "mismatch (path B)"

    # Case 2: hidden size multiple of 128 (3-D lane-dense path A), bf16
    # activations + f32 table to exercise the in-kernel f32 accumulate/cast,
    # and the full (max_len, H) table passed without a wrapper-side slice.
    B2, T2, H2, MAX_LEN2 = 2, 16, 128, 64
    x2 = jax.random.normal(k2, (B2, T2, H2), dtype=jnp.bfloat16)
    emb_f32 = sinusoidal_table(MAX_LEN2, H2)
    out2 = jax.block_until_ready(
        positional_embedding_forward(x2, emb_f32, min_pallas_bytes=0))
    assert out2.shape == (B2, T2, H2)
    assert jnp.allclose(out2.astype(jnp.float32),
                        ref_add(x2, emb_f32).astype(jnp.float32),
                        atol=1e-2), "mismatch (path A)"

    # Case 3: default size gate (tiny shape -> fused XLA add), same semantics.
    out3 = jax.block_until_ready(positional_embedding_forward(x2, emb_f32))
    assert jnp.allclose(out3.astype(jnp.float32),
                        ref_add(x2, emb_f32).astype(jnp.float32),
                        atol=1e-2), "mismatch (gated path)"

    print("KERNEL_OK")
</pallas_src>

<mosaic_0001>
module attributes {stable_mosaic.version = 11 : i64} {
  func.func @_add_pos_kernel(%arg0: i32, %arg1: i32, %arg2: memref<2x256xf32, #tpu.memory_space<vmem>>, %arg3: memref<1x256xf32, #tpu.memory_space<vmem>>, %arg4: memref<2x256xf32, #tpu.memory_space<vmem>>) attributes {dimension_semantics = [#tpu.dimension_semantics<parallel>, #tpu.dimension_semantics<parallel>], iteration_bounds = array<i64: 1, 1>, scalar_prefetch = 0 : i64, scratch_operands = 0 : i64, tpu.core_type = #tpu.core_type<tc>, window_params = [{transform_indices = @transform_0, window_bounds = array<i64: 2, 256>}, {transform_indices = @transform_1, window_bounds = array<i64: 1, 256>}, {transform_indices = @transform_2, window_bounds = array<i64: 2, 256>}]} {
    %c0 = arith.constant 0 : index
    %c0_0 = arith.constant 0 : index
    %0 = vector.load %arg2[%c0, %c0_0] : memref<2x256xf32, #tpu.memory_space<vmem>>, vector<2x256xf32>
    %c0_1 = arith.constant 0 : index
    %c0_2 = arith.constant 0 : index
    %1 = vector.load %arg3[%c0_1, %c0_2] : memref<1x256xf32, #tpu.memory_space<vmem>>, vector<1x256xf32>
    %2 = vector.broadcast %1 : vector<1x256xf32> to vector<2x256xf32>
    %3 = arith.addf %0, %2 : vector<2x256xf32>
    %c0_3 = arith.constant 0 : index
    %c0_4 = arith.constant 0 : index
    %4 = vector.load %arg4[%c0_3, %c0_4] : memref<2x256xf32, #tpu.memory_space<vmem>>, vector<2x256xf32>
    tpu.vector_store %arg4[%c0_3, %c0_4], %3 {strides = array<i32>} : memref<2x256xf32, #tpu.memory_space<vmem>>, vector<2x256xf32>,
    return
  }
  func.func @transform_0(%arg0: i32, %arg1: i32) -> (i32, i32) {
    %c0_i32 = arith.constant 0 : i32
    return %arg1, %arg0 : i32, i32
  }
  func.func @transform_1(%arg0: i32, %arg1: i32) -> (i32, i32) {
    %c0_i32 = arith.constant 0 : i32
    %c0_i32_0 = arith.constant 0 : i32
    return %c0_i32, %arg0 : i32, i32
  }
  func.func @transform_2(%arg0: i32, %arg1: i32) -> (i32, i32) {
    %c0_i32 = arith.constant 0 : i32
    return %arg1, %arg0 : i32, i32
  }
}

</mosaic_0001>

<bundles_post_ra>
// kernel: tpu_custom_call.1
= control target key start
LH: loop header
LB: loop body
LE: loop exit
PB: predicated region body
PF: predicated region fallthrough
CT: control target
= control target key end

     0   :  { %7 = vsyncpa [#allocation3], 0  ;;  %s157_s0 = inlined_call_operand.hbm [shape: f32[2,256], index: 0, kind: input, shape index: {}]   ;;  %s158_s1 = inlined_call_operand.vmem [shape: f32[1,256], index: 1, kind: input, shape index: {}]   ;;  %s159_s2 = inlined_call_operand.hbm [shape: f32[2,256], index: 2, kind: output, shape index: {}]  }
   0x1   :  { %8 = vsyncpa [#allocation4], 0  ;;  %s112_s9 = smov [#allocation2]   ;;  %s64_s13 = scalar_lea.hbm %s157_s0, 64 }
   0x2   :  { %s15_s10 = sshll.u32 %s112_s9, 4  ;;  %p65_p0 = scmp.ne.s32.totalorder %s157_s0, %s64_s13  ;;  %s16_s10 = int_to_ptr.vmem [resolvable:$true] %s15_s10 }
   0x3   :  { %p68_p1 = scmp.lt.u32.totalorder %s64_s13, %s157_s0 }
   0x5   :  { %p70_p2 = pnand %p68_p1, %p65_p0 }
   0x7   :  { %73 = shalt.err (!%p70_p2)
}
   0x8   :  { %s74_s18 = scalar_lea.vmem %s16_s10, 64  ;;  %p79_p4 = scmp.lt.s32.totalorder %s16_s10, %s16_s10 }
   0x9   :  { %p75_p3 = scmp.ne.s32.totalorder %s16_s10, %s74_s18  ;;  %p80_p5 = scmp.lt.s32.totalorder %s74_s18, %s74_s18 }
   0xb   :  { %p81_p6 = por %p80_p5, %p79_p4 }
   0xd   :  { %p82_p7 = pnand %p81_p6, %p75_p3 }
   0xf   :  { %85 = shalt.err (!%p82_p7)
}
  0x10   :  { %18 = dma.hbm_to_vmem [thread:$0]  %s157_s0, 64, %s16_s10, [#allocation3]  }
  0x11   :  { %108 = dma.done.wait [#allocation3], 64  }
  0x12   :  { %109 = vsyncadd [#allocation3], 4294967232  ;;  %v27_v0 = vlaneseq  ;;  %v113_v1 = vmov 1983009808   ;;  %v25_v7 = vld [vmem:[%s158_s1] sm:$0x3] }
  0x13   :  { %v37_v2 = vunpack.c.l.s4 %v113_v1  ;;  %v24_v12 = vld [vmem:[#allocation2] sm:$0xf]  ;;  %s114_s23 = smov [#allocation5]  }
  0x14   :  { %v28_v3 = vshrl.u32 %v27_v0, 7  ;;  %s52_s0 = sshll.u32 %s114_s23, 4  ;;  %s53_s0 = int_to_ptr.vmem [resolvable:$true] %s52_s0 }
  0x15   :  { %v38_v6 = vunpack.c.0.s8 %v37_v2  ;;  %s86_s24 = scalar_lea.vmem %s53_s0, 64  ;;  %p91_p9 = scmp.lt.s32.totalorder %s53_s0, %s53_s0 }
  0x16   :  { %v29_v4 = vsub.s32 0, %v28_v3  ;;  %v33_v5 = vsub.s32 1, %v28_v3  ;;  %p87_p8 = scmp.ne.s32.totalorder %s53_s0, %s86_s24  ;;  %p92_p10 = scmp.lt.s32.totalorder %s86_s24, %s86_s24 }
  0x17   :  { %v41_v10 = vsub.s32 %v38_v6, %v28_v3 }
  0x18   :  { %v30_v8 = vrot.slane %v25_v7, %v29_v4  ;;  %v34_v9 = vrot.slane %v25_v7, %v33_v5  ;;  %p93_p11 = por %p92_p10, %p91_p9 }
  0x1a   :  { %v35_v11 = vcombine.low %v30_v8, %v34_v9  ;;  %p94_p12 = pnand %p93_p11, %p87_p8 }
  0x1c   :  { %v42_v13 = vrot.slane %v35_v11, %v41_v10 }
  0x1e   :  { %v44_v14 = vadd.f32 %v42_v13, %v24_v12 }
  0x20   :  { %45 = vst [vmem:[#allocation5] sm:$0xf] %v44_v14 }
  0x21   :  { %97 = shalt.err (!%p94_p12)
}
  0x22   :  { %s98_s26 = scalar_lea.hbm %s159_s2, 64 }
  0x23   :  { %p99_p13 = scmp.ne.s32.totalorder %s159_s2, %s98_s26  ;;  %p102_p0 = scmp.lt.u32.totalorder %s98_s26, %s159_s2 }
  0x25   :  { %p104_p1 = pnand %p102_p0, %p99_p13 }
  0x27   :  { %107 = shalt.err (!%p104_p1)
}
  0x28   :  { %55 = dma.vmem_to_hbm [thread:$0]  %s53_s0, 64, %s159_s2, [#allocation4]  }
  0x29   :  { %110 = dma.done.wait [#allocation4], 64  }
  0x2a   :  { %111 = vsyncadd [#allocation4], 4294967232 }
  0x2b   :  { %59 = vsyncpa [#allocation3], 1 }
  0x2c   :  { %60 = vsyncpa [#allocation4], 1 }

</bundles_post_ra>
